<compile_context>
chip_gen: v7x
topology: tpu7x:2x2x1
jax: 0.10.0
libtpu: 0.0.40
codegen_flags: <defaults>
</compile_context>

<pallas_src>
import jax
import jax.numpy as jnp
from jax.experimental import pallas as pl
from jax.experimental.pallas import tpu as pltpu


def _se_kernel(x_ref, w_ref, b_ref, feat_ref, out_ref):
    # x_ref:    [Cin, 1]       (full squeeze vector, same for every grid step)
    # w_ref:    [tile_c, Cin]  (Cout-tile of the 1x1 conv weight)
    # b_ref:    [tile_c, 1]
    # feat_ref: [tile_c, HW]
    # out_ref:  [tile_c, HW]
    # 1x1 conv on a 1x1 spatial input == matvec: W @ x + b  (MXU)
    s = jnp.dot(w_ref[...], x_ref[...], preferred_element_type=jnp.float32) + b_ref[...]
    # sigmoid(s) == 0.5 * (tanh(s/2) + 1): one EUP op per vreg, no VPU divide.
    gate = 0.5 * (jnp.tanh(0.5 * s) + 1.0)          # shape [tile_c, 1]
    out_ref[...] = (gate * feat_ref[...]).astype(out_ref.dtype)


def _pick_num_tiles(cout):
    # Small tile count (2-4): per-grid-step overhead (~0.35 us) must not
    # dominate this ~1 us kernel. Sublane dim of each tile must stay a
    # multiple of 8.
    for n in (4, 3, 2):
        if cout % n == 0 and (cout // n) % 8 == 0:
            return n
    return 1


def se_conv_sigmoid_mul(x252, x249, weight, bias):
    """x252: [1, Cin, 1, 1], x249: [1, Cout, H, W], weight: [Cout, Cin, 1, 1], bias: [Cout]."""
    n, cin, _, _ = x252.shape
    nb, cout, h, w = x249.shape
    assert n == 1 and nb == 1
    hw = h * w

    x_vec = x252.reshape(cin, 1)
    w2d = weight.reshape(cout, cin)
    b2d = bias.reshape(cout, 1)
    feat = x249.reshape(cout, hw)

    num_tiles = _pick_num_tiles(cout)      # 816 -> 3 tiles of 272
    tile_c = cout // num_tiles

    out = pl.pallas_call(
        _se_kernel,
        out_shape=jax.ShapeDtypeStruct((cout, hw), x249.dtype),
        grid=(num_tiles,),
        in_specs=[
            pl.BlockSpec((cin, 1), lambda i: (0, 0)),
            pl.BlockSpec((tile_c, cin), lambda i: (i, 0)),
            pl.BlockSpec((tile_c, 1), lambda i: (i, 0)),
            pl.BlockSpec((tile_c, hw), lambda i: (i, 0)),
        ],
        out_specs=pl.BlockSpec((tile_c, hw), lambda i: (i, 0)),
        # Gated result overwrites the feature-map buffer (feat is dead after).
        input_output_aliases={3: 0},
        compiler_params=pltpu.CompilerParams(
            dimension_semantics=("parallel",)   # shard Cout tiles across TCs on v7x
        ),
    )(x_vec, w2d, b2d, feat)

    return out.reshape(1, cout, h, w)


if __name__ == "__main__":
    key = jax.random.PRNGKey(0)
    k1, k2, k3, k4 = jax.random.split(key, 4)

    CIN, COUT, H, W = 34, 816, 14, 14

    # Deterministic synthetic inputs / parameters (module shapes).
    x252 = jax.random.normal(k1, (1, CIN, 1, 1), dtype=jnp.float32)
    x249 = jax.random.normal(k2, (1, COUT, H, W), dtype=jnp.float32)
    weight = jax.random.normal(k3, (COUT, CIN, 1, 1), dtype=jnp.float32) * 0.05
    bias = jax.random.normal(k4, (COUT,), dtype=jnp.float32) * 0.05

    # Pure-JAX reference for sanity (computed before the kernel call).
    s_ref = (weight.reshape(COUT, CIN) @ x252.reshape(CIN, 1)) + bias.reshape(COUT, 1)
    gate_ref = jax.nn.sigmoid(s_ref).reshape(1, COUT, 1, 1)
    ref = gate_ref * x249

    out = se_conv_sigmoid_mul(x252, x249, weight, bias)
    out = jax.block_until_ready(out)

    assert out.shape == (1, COUT, H, W)
    assert jnp.allclose(out, ref, atol=1e-5, rtol=1e-5)

    print("KERNEL_OK")
</pallas_src>

<mosaic_0001>
module attributes {stable_mosaic.version = 11 : i64} {
  func.func @_se_kernel(%arg0: i32, %arg1: memref<34x1xf32, #tpu.memory_space<vmem>>, %arg2: memref<272x34xf32, #tpu.memory_space<vmem>>, %arg3: memref<272x1xf32, #tpu.memory_space<vmem>>, %arg4: memref<272x196xf32, #tpu.memory_space<vmem>>, %arg5: memref<272x196xf32, #tpu.memory_space<vmem>>) attributes {dimension_semantics = [#tpu.dimension_semantics<parallel>], iteration_bounds = array<i64: 3>, scalar_prefetch = 0 : i64, scratch_operands = 0 : i64, tpu.core_type = #tpu.core_type<tc>, window_params = [{pipeline_mode = #tpu.pipeline_mode<synchronous>, transform_indices = @transform_0, window_bounds = array<i64: 34, 1>}, {transform_indices = @transform_1, window_bounds = array<i64: 272, 34>}, {transform_indices = @transform_2, window_bounds = array<i64: 272, 1>}, {transform_indices = @transform_3, window_bounds = array<i64: 272, 196>}, {transform_indices = @transform_4, window_bounds = array<i64: 272, 196>}]} {
    %c0 = arith.constant 0 : index
    %c0_0 = arith.constant 0 : index
    %0 = vector.load %arg2[%c0, %c0_0] : memref<272x34xf32, #tpu.memory_space<vmem>>, vector<272x34xf32>
    %c0_1 = arith.constant 0 : index
    %c0_2 = arith.constant 0 : index
    %1 = vector.load %arg1[%c0_1, %c0_2] : memref<34x1xf32, #tpu.memory_space<vmem>>, vector<34x1xf32>
    %cst = arith.constant dense<0.000000e+00> : vector<272x1xf32>
    %2 = tpu.matmul %0, %1, %cst {dimension_numbers = #tpu.dot_dimension_numbers<[1], [0], [0], [1], [0, 0, 1, 1], [], []>} : vector<272x34xf32>, vector<34x1xf32>, vector<272x1xf32> -> vector<272x1xf32>
    %c0_3 = arith.constant 0 : index
    %c0_4 = arith.constant 0 : index
    %3 = vector.load %arg3[%c0_3, %c0_4] : memref<272x1xf32, #tpu.memory_space<vmem>>, vector<272x1xf32>
    %4 = arith.addf %2, %3 : vector<272x1xf32>
    %cst_5 = arith.constant 5.000000e-01 : f32
    %5 = vector.broadcast %cst_5 : f32 to vector<272x1xf32>
    %6 = arith.mulf %5, %4 : vector<272x1xf32>
    %7 = math.tanh %6 : vector<272x1xf32>
    %cst_6 = arith.constant 1.000000e+00 : f32
    %8 = vector.broadcast %cst_6 : f32 to vector<272x1xf32>
    %9 = arith.addf %7, %8 : vector<272x1xf32>
    %cst_7 = arith.constant 5.000000e-01 : f32
    %10 = vector.broadcast %cst_7 : f32 to vector<272x1xf32>
    %11 = arith.mulf %10, %9 : vector<272x1xf32>
    %c0_8 = arith.constant 0 : index
    %c0_9 = arith.constant 0 : index
    %12 = vector.load %arg4[%c0_8, %c0_9] : memref<272x196xf32, #tpu.memory_space<vmem>>, vector<272x196xf32>
    %13 = vector.broadcast %11 : vector<272x1xf32> to vector<272x196xf32>
    %14 = arith.mulf %13, %12 : vector<272x196xf32>
    %c0_10 = arith.constant 0 : index
    %c0_11 = arith.constant 0 : index
    %15 = vector.load %arg5[%c0_10, %c0_11] : memref<272x196xf32, #tpu.memory_space<vmem>>, vector<272x196xf32>
    tpu.vector_store %arg5[%c0_10, %c0_11], %14 {strides = array<i32>} : memref<272x196xf32, #tpu.memory_space<vmem>>, vector<272x196xf32>,
    return
  }
  func.func @transform_0(%arg0: i32) -> (i32, i32) {
    %c0_i32 = arith.constant 0 : i32
    %c0_i32_0 = arith.constant 0 : i32
    %c0_i32_1 = arith.constant 0 : i32
    return %c0_i32, %c0_i32_0 : i32, i32
  }
  func.func @transform_1(%arg0: i32) -> (i32, i32) {
    %c0_i32 = arith.constant 0 : i32
    %c0_i32_0 = arith.constant 0 : i32
    return %arg0, %c0_i32 : i32, i32
  }
  func.func @transform_2(%arg0: i32) -> (i32, i32) {
    %c0_i32 = arith.constant 0 : i32
    %c0_i32_0 = arith.constant 0 : i32
    return %arg0, %c0_i32 : i32, i32
  }
  func.func @transform_3(%arg0: i32) -> (i32, i32) {
    %c0_i32 = arith.constant 0 : i32
    %c0_i32_0 = arith.constant 0 : i32
    return %arg0, %c0_i32 : i32, i32
  }
  func.func @transform_4(%arg0: i32) -> (i32, i32) {
    %c0_i32 = arith.constant 0 : i32
    %c0_i32_0 = arith.constant 0 : i32
    return %arg0, %c0_i32 : i32, i32
  }
}

</mosaic_0001>

<bundles_post_ra>
// kernel: tpu_custom_call.1
= control target key start
LH: loop header
LB: loop body
LE: loop exit
PB: predicated region body
PF: predicated region fallthrough
CT: control target
= control target key end

     0   :  { %s1535_s15 = smov 0   ;;  %s2109_s0 = inlined_call_operand.vmem [shape: f32[34,1], index: 0, kind: input, shape index: {}]   ;;  %s2110_s1 = inlined_call_operand.vmem [shape: f32[816,34], index: 1, kind: input, shape index: {}]   ;;  %s2111_s2 = inlined_call_operand.vmem [shape: f32[816,1], index: 2, kind: input, shape index: {}]   ;;  %s2112_s3 = inlined_call_operand.vmem [shape: f32[816,196], index: 3, kind: input, shape index: {}, may-alias: {3,4}]   ;;  %s2113_s4 = inlined_call_operand.vmem [shape: f32[816,196], index: 4, kind: output, shape index: {}, may-alias: {3,4}]  }
   0x1 LB: > { %s1258_s16 = sadd.s32 4294967295, %s1507_s15   ;;  %p1262_p0 = scmp.ge.s32.totalorder %s1507_s15, 1  ;;  %s1507_s15 = sphi %s1535_s15, %s14_s15  }
   0x2   : > { %p186_p1 = scmp.lt.s32.totalorder %s1507_s15, 4 }
   0x4   : > { %p187_p2 = pnand %p1262_p0, %p186_p1 }
   0x6   : > { %190 = sbr.rel (%p187_p2) target bundleno = 453 (0x1c5), region = 36 }
   0xd   : > { %v284_v0 = vld [vmem:[%s2109_s0] sm:$0xff]  ;;  %v285_v1 = vld [vmem:[%s2109_s0 + $0x8] sm:$0xff]  ;;  %v286_v2 = vld [vmem:[%s2109_s0 + $0x10] sm:$0xff]  ;;  %s224_s23 = smul.u32 34, %s1258_s16  ;;  %vm426_vm0 = vcmask 1041408   ;;  %vm323_vm1 = vcmask 277504  }
   0xe   : > { %v1408_v3 = vpack.c.bf16 %v285_v1, %v284_v0  ;;  %v287_v4 = vld [vmem:[%s2109_s0 + $0x18] sm:$0xff]  ;;  %v288_v6 = vld [vmem:[%s2109_s0 + $0x20] sm:$0x3]  ;;  %v1509_v41 = vmov 0   ;;  %vm1108_vm2 = vcmask 556032  }
   0xf   : > { %v1412_v5 = vpack.c.bf16 %v287_v4, %v286_v2  ;;  %p225_p3 = scmp.lt.s32.totalorder %s224_s23, 101  ;;  %1432 = vset.pattern.permute.xlu1 %v1509_v41  ;;  %1431 = vset.pattern.permute.xlu0 %v1509_v41 }
  0x10   : > { %1409 = vmatprep.subr.bf16.mxu0 %v1408_v3  ;;  %1416 = vmatprep.subr.bf16.mxu1 %v1408_v3 }
  0x11   : > { %1411 = vmatpush3.bf16.msra.mxu0 %v1408_v3  ;;  %1419 = vmatpush3.bf16.msra.mxu1 %v1408_v3  ;;  %s2139_s23 = smov (!%p225_p3, %s224_s23), 101 }
  0x12   : > { %1413 = vmatprep.subr.bf16.mxu0 %v1412_v5  ;;  %1417 = vmatprep.subr.bf16.mxu1 %v1412_v5  ;;  %s1263_s28 = sshll.u32 %s2139_s23, 3  ;;  %s1306_s9 = sshll.u32 %s2139_s23, 4 }
  0x13   : > { %s1566_s5 = scalar_lea.vmem %s2110_s1, %s1263_s28  ;;  %s1645_s8 = scalar_lea.vmem %s2111_s2, %s1263_s28 }
  0x14   : > { %v250_v7 = vld [vmem:[%s1566_s5] sm:$0xff]  ;;  %v268_v8 = vld [vmem:[%s1566_s5 + $0x90] sm:$0xff]  ;;  %v251_v9 = vld [vmem:[%s1566_s5 + $0x8] sm:$0xff]  ;;  %s1723_s12 = scalar_lea.vmem %s2112_s3, %s1306_s9  ;;  %s1925_s16 = scalar_lea.vmem %s2113_s4, %s1306_s9 }
  0x15   : > { %1415 = vmatpush3.bf16.msra.mxu0 %v1412_v5  ;;  %1420 = vmatpush3.bf16.msra.mxu1 %v1412_v5  ;;  %v269_v10 = vld [vmem:[%s1566_s5 + $0x98] sm:$0xff]  ;;  %v252_v11 = vld [vmem:[%s1566_s5 + $0x10] sm:$0xff]  ;;  %v270_v12 = vld [vmem:[%s1566_s5 + $0xa0] sm:$0xff] }
  0x16   : > { %1355 = vmatprep.subr.msk.mxu0 %vm426_vm0, %v288_v6  ;;  %1418 = vmatprep.subr.msk.mxu1 %vm426_vm0, %v288_v6  ;;  %v253_v13 = vld [vmem:[%s1566_s5 + $0x18] sm:$0xff]  ;;  %v271_v14 = vld [vmem:[%s1566_s5 + $0xa8] sm:$0xff]  ;;  %v254_v15 = vld [vmem:[%s1566_s5 + $0x20] sm:$0xff] }
  0x17   : > { %1357 = vmatprep.mubr.msk.f32.mxu0 %vm323_vm1, %v250_v7  ;;  %1384 = vmatprep.mubr.msk.f32.mxu1 %vm323_vm1, %v268_v8  ;;  %v272_v16 = vld [vmem:[%s1566_s5 + $0xb0] sm:$0xff]  ;;  %v255_v17 = vld [vmem:[%s1566_s5 + $0x28] sm:$0xff]  ;;  %v273_v18 = vld [vmem:[%s1566_s5 + $0xb8] sm:$0xff] }
  0x18   : > { %v256_v19 = vld [vmem:[%s1566_s5 + $0x30] sm:$0xff]  ;;  %v274_v20 = vld [vmem:[%s1566_s5 + $0xc0] sm:$0xff]  ;;  %v257_v21 = vld [vmem:[%s1566_s5 + $0x38] sm:$0xff] }
  0x19   : > { %1356 = vmatpush3.msk.msra.mxu0 %vm426_vm0, %v288_v6  ;;  %1421 = vmatpush3.msk.msra.mxu1 %vm426_vm0, %v288_v6  ;;  %v275_v22 = vld [vmem:[%s1566_s5 + $0xc8] sm:$0xff]  ;;  %v258_v23 = vld [vmem:[%s1566_s5 + $0x40] sm:$0xff]  ;;  %v276_v24 = vld [vmem:[%s1566_s5 + $0xd0] sm:$0xff] }
  0x1a   : > { %1358 = vmatmul.mubr.msk.f32.vlgmr.msra.gmra.mrb[0].mxu0 %vm323_vm1, %v251_v9  ;;  %1385 = vmatmul.mubr.msk.f32.vlgmr.msra.gmra.mrb[0].mxu1 %vm323_vm1, %v269_v10  ;;  %v259_v25 = vld [vmem:[%s1566_s5 + $0x48] sm:$0xff]  ;;  %v277_v26 = vld [vmem:[%s1566_s5 + $0xd8] sm:$0xff]  ;;  %v260_v27 = vld [vmem:[%s1566_s5 + $0x50] sm:$0xff] }
  0x1b   : > { %1360 = vmatprep.mubr.msk.f32.mxu0 %vm323_vm1, %v252_v11  ;;  %1387 = vmatprep.mubr.msk.f32.mxu1 %vm323_vm1, %v270_v12  ;;  %v278_v28 = vld [vmem:[%s1566_s5 + $0xe0] sm:$0xff]  ;;  %v261_v29 = vld [vmem:[%s1566_s5 + $0x58] sm:$0xff]  ;;  %v279_v30 = vld [vmem:[%s1566_s5 + $0xe8] sm:$0xff] }
  0x1c   : > { %v262_v31 = vld [vmem:[%s1566_s5 + $0x60] sm:$0xff]  ;;  %v280_v32 = vld [vmem:[%s1566_s5 + $0xf0] sm:$0xff]  ;;  %v263_v33 = vld [vmem:[%s1566_s5 + $0x68] sm:$0xff] }
  0x1d   : > { %v281_v34 = vld [vmem:[%s1566_s5 + $0xf8] sm:$0xff]  ;;  %v264_v35 = vld [vmem:[%s1566_s5 + $0x70] sm:$0xff]  ;;  %v282_v36 = vld [vmem:[%s1566_s5 + $0x100] sm:$0xff] }
  0x1e   : > { %1361 = vmatmul.mubr.msk.f32.gmra.mrb[2].mxu0 %vm323_vm1, %v253_v13  ;;  %1388 = vmatmul.mubr.msk.f32.gmra.mrb[2].mxu1 %vm323_vm1, %v271_v14  ;;  %v265_v37 = vld [vmem:[%s1566_s5 + $0x78] sm:$0xff]  ;;  %v283_v38 = vld [vmem:[%s1566_s5 + $0x108] sm:$0xff]  ;;  %v266_v39 = vld [vmem:[%s1566_s5 + $0x80] sm:$0xff] }
  0x1f   : > { %1363 = vmatprep.mubr.msk.f32.mxu0 %vm323_vm1, %v254_v15  ;;  %1390 = vmatprep.mubr.msk.f32.mxu1 %vm323_vm1, %v272_v16  ;;  %v267_v40 = vld [vmem:[%s1566_s5 + $0x88] sm:$0xff]  ;;  %v308_v43 = vld [vmem:[%s1645_s8 + $0x98] sm:$0xff]  ;;  %v289_v44 = vld [vmem:[%s1645_s8] sm:$0xff] }
  0x20   : > { %v290_v42 = vld [vmem:[%s1645_s8 + $0x8] sm:$0xff]  ;;  %v307_v45 = vld [vmem:[%s1645_s8 + $0x90] sm:$0xff]  ;;  %v292_v54 = vld [vmem:[%s1645_s8 + $0x18] sm:$0xff] }
  0x21   : > { %v310_v55 = vld [vmem:[%s1645_s8 + $0xa8] sm:$0xff]  ;;  %v291_v58 = vld [vmem:[%s1645_s8 + $0x10] sm:$0xff]  ;;  %v309_v59 = vld [vmem:[%s1645_s8 + $0xa0] sm:$0xff] }
  0x22   : > { %1364 = vmatmul.mubr.msk.f32.gmra.mrb[4].mxu0 %vm323_vm1, %v255_v17  ;;  %1391 = vmatmul.mubr.msk.f32.gmra.mrb[4].mxu1 %vm323_vm1, %v273_v18  ;;  %v294_v6 = vld [vmem:[%s1645_s8 + $0x28] sm:$0xff]  ;;  %v293_v9 = vld [vmem:[%s1645_s8 + $0x20] sm:$0xff]  ;;  %v311_v12 = vld [vmem:[%s1645_s8 + $0xb0] sm:$0xff] }
  0x23   : > { %1366 = vmatprep.mubr.msk.f32.mxu0 %vm323_vm1, %v256_v19  ;;  %1393 = vmatprep.mubr.msk.f32.mxu1 %vm323_vm1, %v274_v20  ;;  %v312_v16 = vld [vmem:[%s1645_s8 + $0xb8] sm:$0xff] }
  0x26   : > { %1367 = vmatmul.mubr.msk.f32.gmra.mrb[6].mxu0 %vm323_vm1, %v257_v21  ;;  %1394 = vmatmul.mubr.msk.f32.gmra.mrb[6].mxu1 %vm323_vm1, %v275_v22 }
  0x27   : > { %1369 = vmatprep.mubr.msk.f32.mxu0 %vm323_vm1, %v258_v23  ;;  %1396 = vmatprep.mubr.msk.f32.mxu1 %vm323_vm1, %v276_v24 }
  0x2a   : > { %1370 = vmatmul.mubr.msk.f32.gmra.mrb[8].mxu0 %vm323_vm1, %v259_v25  ;;  %1397 = vmatmul.mubr.msk.f32.gmra.mrb[8].mxu1 %vm323_vm1, %v277_v26  ;;  %v295_v25 = vld [vmem:[%s1645_s8 + $0x30] sm:$0xff] }
  0x2b   : > { %1372 = vmatprep.mubr.msk.f32.mxu0 %vm323_vm1, %v260_v27  ;;  %1399 = vmatprep.mubr.msk.f32.mxu1 %vm323_vm1, %v278_v28  ;;  %v296_v27 = vld [vmem:[%s1645_s8 + $0x38] sm:$0xff] }
  0x2e   : > { %1373 = vmatmul.mubr.msk.f32.gmra.mrb[10].mxu0 %vm323_vm1, %v261_v29  ;;  %1400 = vmatmul.mubr.msk.f32.gmra.mrb[10].mxu1 %vm323_vm1, %v279_v30 }
  0x2f   : > { %1375 = vmatprep.mubr.msk.f32.mxu0 %vm323_vm1, %v262_v31  ;;  %1402 = vmatprep.mubr.msk.f32.mxu1 %vm323_vm1, %v280_v32 }
  0x32   : > { %1376 = vmatmul.mubr.msk.f32.gmra.mrb[12].mxu0 %vm323_vm1, %v263_v33  ;;  %1403 = vmatmul.mubr.msk.f32.gmra.mrb[12].mxu1 %vm323_vm1, %v281_v34 }
  0x33   : > { %1378 = vmatprep.mubr.msk.f32.mxu0 %vm323_vm1, %v264_v35  ;;  %1405 = vmatprep.mubr.msk.f32.mxu1 %vm323_vm1, %v282_v36 }
  0x36   : > { %1379 = vmatmul.mubr.msk.f32.gmra.mrb[14].mxu0 %vm323_vm1, %v265_v37  ;;  %1406 = vmatmul.mubr.msk.f32.gmra.mrb[14].mxu1 %vm323_vm1, %v283_v38  ;;  %v313_v37 = vld [vmem:[%s1645_s8 + $0xc0] sm:$0xff] }
  0x37   : > { %1381 = vmatprep.mubr.msk.f32.mxu0 %vm323_vm1, %v266_v39 }
  0x3a   : > { %1382 = vmatmul.mubr.msk.f32.gmra.mrb[16].mxu0 %vm323_vm1, %v267_v40 }
  0xed   : > { %v1359_v46 = vpop.f32.mrb[0].mxu0  ;;  %v1386_v47 = vpop.f32.mrb[0].mxu1 }
  0xee   : > { %v502_v48 = vadd.f32 %v1359_v46, %v290_v42  ;;  %v592_v49 = vadd.f32 %v1386_v47, %v308_v43  ;;  %v496_v50 = vpop.f32.mrb[1].mxu0  ;;  %v586_v51 = vpop.f32.mrb[1].mxu1  ;;  %v314_v42 = vld [vmem:[%s1645_s8 + $0xc8] sm:$0xff] }
  0xef   : > { %v497_v52 = vadd.f32 %v496_v50, %v289_v44  ;;  %v587_v53 = vadd.f32 %v586_v51, %v307_v45 }
  0xf0   : > { %v666_v56 = vmul.f32 0.5, %v502_v48  ;;  %v684_v57 = vmul.f32 0.5, %v592_v49 }
  0xf1   : > { %v665_v60 = vmul.f32 0.5, %v497_v52  ;;  %v683_v61 = vmul.f32 0.5, %v587_v53  ;;  %v1362_v62 = vpop.f32.mrb[2].mxu0  ;;  %v1389_v63 = vpop.f32.mrb[2].mxu1 }
  0xf2   : > { %1433 = vtanh.f32 %v666_v56  ;;  %v512_v0 = vadd.f32 %v1362_v62, %v292_v54  ;;  %v506_v1 = vpop.f32.mrb[3].mxu0  ;;  %v602_v2 = vadd.f32 %v1389_v63, %v310_v55  ;;  %v596_v3 = vpop.f32.mrb[3].mxu1  ;;  %v297_v55 = vld [vmem:[%s1645_s8 + $0x40] sm:$0xff] }
  0xf3   : > { %1435 = vtanh.f32 %v684_v57  ;;  %v507_v4 = vadd.f32 %v506_v1, %v291_v58  ;;  %v597_v5 = vadd.f32 %v596_v3, %v309_v59  ;;  %v298_v59 = vld [vmem:[%s1645_s8 + $0x48] sm:$0xff] }
  0xf4   : > { %1437 = vtanh.f32 %v665_v60  ;;  %v668_v7 = vmul.f32 0.5, %v512_v0  ;;  %v686_v8 = vmul.f32 0.5, %v602_v2 }
  0xf5   : > { %1439 = vtanh.f32 %v683_v61  ;;  %v1365_v10 = vpop.f32.mrb[4].mxu0  ;;  %v1392_v11 = vpop.f32.mrb[4].mxu1  ;;  %v685_v13 = vmul.f32 0.5, %v597_v5  ;;  %v667_v18 = vmul.f32 0.5, %v507_v4 }
  0xf6   : > { %1441 = vtanh.f32 %v668_v7  ;;  %v522_v14 = vadd.f32 %v1365_v10, %v294_v6  ;;  %v516_v15 = vpop.f32.mrb[5].mxu0  ;;  %v606_v17 = vpop.f32.mrb[5].mxu1  ;;  %v612_v23 = vadd.f32 %v1392_v11, %v312_v16 }
  0xf7   : > { %v517_v19 = vadd.f32 %v516_v15, %v293_v9  ;;  %1443 = vtanh.f32 %v686_v8  ;;  %v607_v20 = vadd.f32 %v606_v17, %v311_v12  ;;  %v315_v8 = vld [vmem:[%s1645_s8 + $0xd0] sm:$0xff] }
  0xf8   : > { %v670_v21 = vmul.f32 0.5, %v522_v14  ;;  %1445 = vtanh.f32 %v685_v13  ;;  %v688_v34 = vmul.f32 0.5, %v612_v23  ;;  %v316_v13 = vld [vmem:[%s1645_s8 + $0xd8] sm:$0xff] }
  0xf9   : > { %v669_v22 = vmul.f32 0.5, %v517_v19  ;;  %v1368_v24 = vpop.f32.mrb[6].mxu0  ;;  %v1395_v26 = vpop.f32.mrb[6].mxu1  ;;  %1447 = vtanh.f32 %v667_v18  ;;  %v687_v31 = vmul.f32 0.5, %v607_v20 }
  0xfa   : > { %v526_v28 = vpop.f32.mrb[7].mxu0  ;;  %v616_v29 = vpop.f32.mrb[7].mxu1  ;;  %v532_v36 = vadd.f32 %v1368_v24, %v296_v27  ;;  %v622_v54 = vadd.f32 %v1395_v26, %v314_v42  ;;  %v299_v26 = vld [vmem:[%s1645_s8 + $0x50] sm:$0xff]  ;;  %v317_v42 = vld [vmem:[%s1645_s8 + $0xe0] sm:$0xff] }
  0xfb   : > { %1449 = vtanh.f32 %v669_v22  ;;  %v527_v32 = vadd.f32 %v526_v28, %v295_v25  ;;  %v617_v51 = vadd.f32 %v616_v29, %v313_v37  ;;  %v300_v22 = vld [vmem:[%s1645_s8 + $0x58] sm:$0xff] }
  0xfc   : > { %v1434_v30 = vpop.eup %1433  ;;  %1451 = vtanh.f32 %v670_v21  ;;  %v672_v53 = vmul.f32 0.5, %v532_v36  ;;  %v690_v6 = vmul.f32 0.5, %v622_v54 }
  0xfd   : > { %v1436_v33 = vpop.eup %1435  ;;  %v734_v35 = vadd.f32 1.0, %v1434_v30  ;;  %v1371_v38 = vpop.f32.mrb[8].mxu0  ;;  %1453 = vtanh.f32 %v687_v31  ;;  %v671_v50 = vmul.f32 0.5, %v527_v32  ;;  %v689_v3 = vmul.f32 0.5, %v617_v51 }
  0xfe   : > { %v1398_v39 = vpop.f32.mrb[8].mxu1  ;;  %v1438_v40 = vpop.eup %1437  ;;  %v752_v41 = vadd.f32 1.0, %v1436_v33  ;;  %1455 = vtanh.f32 %v688_v34  ;;  %v542_v7 = vadd.f32 %v1371_v38, %v298_v59 }
  0xff   : > { %v536_v43 = vpop.f32.mrb[9].mxu0  ;;  %v626_v44 = vpop.f32.mrb[9].mxu1  ;;  %v733_v46 = vadd.f32 1.0, %v1438_v40  ;;  %v768_v47 = vmul.f32 0.5, %v734_v35  ;;  %1457 = vtanh.f32 %v671_v50  ;;  %v632_v25 = vadd.f32 %v1398_v39, %v316_v13 }
 0x100   : > { %v1440_v45 = vpop.eup %1439  ;;  %v786_v49 = vmul.f32 0.5, %v752_v41  ;;  %v537_v4 = vadd.f32 %v536_v43, %v297_v55  ;;  %1459 = vtanh.f32 %v672_v53  ;;  %v627_v21 = vadd.f32 %v626_v44, %v315_v8 }
 0x101   : > { %v1442_v48 = vpop.eup %1441  ;;  %876 = vperm.xlu0 %1431, %v768_v47   ;;  %v1374_v56 = vpop.f32.mrb[10].mxu0  ;;  %v751_v62 = vadd.f32 1.0, %v1440_v45  ;;  %v767_v1 = vmul.f32 0.5, %v733_v46  ;;  %1461 = vtanh.f32 %v689_v3  ;;  %v674_v24 = vmul.f32 0.5, %v542_v7  ;;  %v318_v47 = vld [vmem:[%s1645_s8 + $0xe8] sm:$0xff] }
 0x102   : > { %v736_v52 = vadd.f32 1.0, %v1442_v48  ;;  %v1664_v57 = vpop.f32.mrb[10].mxu1  ;;  %v1444_v58 = vpop.eup %1443  ;;  %966 = vperm.xlu1 %1432, %v786_v49   ;;  %v673_v20 = vmul.f32 0.5, %v537_v4  ;;  %1463 = vtanh.f32 %v690_v6  ;;  %v552_v35 = vadd.f32 %v1374_v56, %v300_v22  ;;  %v301_v56 = vld [vmem:[%s1645_s8 + $0x60] sm:$0xff]  ;;  %v304_v22 = vld [vmem:[%s1645_s8 + $0x78] sm:$0xff] }
 0x103   : > { %v546_v60 = vpop.f32.mrb[11].mxu0  ;;  %v1667_v61 = vpop.f32.mrb[11].mxu1  ;;  %v754_v63 = vadd.f32 1.0, %v1444_v58  ;;  %v785_v18 = vmul.f32 0.5, %v751_v62  ;;  %v691_v37 = vmul.f32 0.5, %v627_v21  ;;  %v692_v40 = vmul.f32 0.5, %v632_v25 }
 0x104   : > { %v770_v0 = vmul.f32 0.5, %v736_v52  ;;  %v1446_v2 = vpop.eup %1445  ;;  %1465 = vtanh.f32 %v673_v20  ;;  %v547_v38 = vadd.f32 %v546_v60, %v299_v26  ;;  %v676_v50 = vmul.f32 0.5, %v552_v35  ;;  %v302_v62 = vld [vmem:[%s1645_s8 + $0x68] sm:$0xff] }
 0x105   : > { %v1448_v5 = vpop.eup %1447  ;;  %871 = vperm.xlu0 %1431, %v767_v1   ;;  %v1670_v9 = vpop.f32.mrb[12].mxu0  ;;  %v788_v12 = vmul.f32 0.5, %v754_v63  ;;  %v753_v17 = vadd.f32 1.0, %v1446_v2  ;;  %1467 = vtanh.f32 %v674_v24  ;;  %v637_v52 = vadd.f32 %v1667_v61, %v317_v42  ;;  %v320_v1 = vld [vmem:[%s1645_s8 + $0xf8] sm:$0xff] }
 0x106   : > { %v1672_v10 = vpop.f32.mrb[12].mxu1  ;;  %v1450_v11 = vpop.eup %1449  ;;  %886 = vperm.xlu1 %1432, %v770_v0   ;;  %v735_v19 = vadd.f32 1.0, %v1448_v5  ;;  %1469 = vtanh.f32 %v691_v37  ;;  %v675_v51 = vmul.f32 0.5, %v547_v38  ;;  %v642_v55 = vadd.f32 %v1664_v57, %v318_v47  ;;  %v319_v5 = vld [vmem:[%s1645_s8 + $0xf0] sm:$0xff]  ;;  %v306_v37 = vld [vmem:[%s1645_s8 + $0x88] sm:$0xff] }
 0x107   : > { %v1675_v14 = vpop.f32.mrb[13].mxu0  ;;  %v1677_v15 = vpop.f32.mrb[13].mxu1  ;;  %v737_v23 = vadd.f32 1.0, %v1450_v11  ;;  %v787_v34 = vmul.f32 0.5, %v753_v17  ;;  %1471 = vtanh.f32 %v692_v40  ;;  %v693_v0 = vmul.f32 0.5, %v637_v52 }
 0x108   : > { %v1452_v16 = vpop.eup %1451  ;;  %v769_v36 = vmul.f32 0.5, %v735_v19  ;;  %1473 = vtanh.f32 %v676_v50  ;;  %v557_v61 = vadd.f32 %v1675_v14, %v301_v56  ;;  %v694_v3 = vmul.f32 0.5, %v642_v55 }
 0x109   : > { %961 = vperm.xlu0 %1431, %v785_v18   ;;  %v1681_v27 = vpop.f32.mrb[14].mxu0  ;;  %v1683_v28 = vpop.f32.mrb[14].mxu1  ;;  %v738_v30 = vadd.f32 1.0, %v1452_v16  ;;  %v771_v41 = vmul.f32 0.5, %v737_v23  ;;  %1475 = vtanh.f32 %v675_v51  ;;  %v562_v57 = vadd.f32 %v1670_v9, %v302_v62  ;;  %v303_v9 = vld [vmem:[%s1645_s8 + $0x70] sm:$0xff] }
 0x10a   : > { %v1454_v29 = vpop.eup %1453  ;;  %976 = vperm.xlu1 %1432, %v788_v12   ;;  %v1685_v31 = vpop.f32.mrb[15].mxu0  ;;  %v652_v12 = vadd.f32 %v1672_v10, %v320_v1  ;;  %1477 = vtanh.f32 %v693_v0  ;;  %v677_v13 = vmul.f32 0.5, %v557_v61  ;;  %v647_v14 = vadd.f32 %v1677_v15, %v319_v5 }
 0x10b   : > { %v1687_v32 = vpop.f32.mrb[15].mxu1  ;;  %v1456_v33 = vpop.eup %1455  ;;  %v755_v39 = vadd.f32 1.0, %v1454_v29  ;;  %v772_v46 = vmul.f32 0.5, %v738_v30  ;;  %1479 = vtanh.f32 %v694_v3  ;;  %v678_v17 = vmul.f32 0.5, %v562_v57 }
 0x10c   : > { %v1458_v44 = vpop.eup %1457  ;;  %v756_v45 = vadd.f32 1.0, %v1456_v33  ;;  %v696_v24 = vmul.f32 0.5, %v652_v12  ;;  %1481 = vtanh.f32 %v677_v13  ;;  %v695_v10 = vmul.f32 0.5, %v647_v14  ;;  %v305_v33 = vld [vmem:[%s1645_s8 + $0x80] sm:$0xff] }
 0x10d   : > { %971 = vperm.xlu0 %1431, %v787_v34   ;;  %v1690_v43 = vpop.f32.mrb[16].mxu0  ;;  %v1460_v49 = vpop.eup %1459  ;;  %v739_v53 = vadd.f32 1.0, %v1458_v44  ;;  %v789_v54 = vmul.f32 0.5, %v755_v39  ;;  %v567_v25 = vadd.f32 %v1685_v31, %v303_v9  ;;  %1483 = vtanh.f32 %v678_v17  ;;  %v321_v44 = vld [vmem:[%s1645_s8 + $0x100] sm:$0xff] }
 0x10e   : > { %881 = vperm.xlu1 %1432, %v769_v36   ;;  %v1693_v48 = vpop.f32.mrb[17].mxu0  ;;  %v1462_v58 = vpop.eup %1461  ;;  %v740_v59 = vadd.f32 1.0, %v1460_v49  ;;  %v790_v60 = vmul.f32 0.5, %v756_v45  ;;  %v572_v30 = vadd.f32 %v1681_v27, %v304_v22  ;;  %1485 = vtanh.f32 %v696_v24  ;;  %v322_v27 = vld [vmem:[%s1645_s8 + $0x108] sm:$0xff] }
 0x10f   : > { %v1464_v63 = vpop.eup %1463  ;;  %v757_v2 = vadd.f32 1.0, %v1462_v58  ;;  %v773_v4 = vmul.f32 0.5, %v739_v53  ;;  %1487 = vtanh.f32 %v695_v10  ;;  %v679_v38 = vmul.f32 0.5, %v567_v25  ;;  %v1726_v25 = vld [vmem:[%s1723_s12 + $0x130] sm:$0xff] }
 0x110   : > { %v1466_v6 = vpop.eup %1465  ;;  %v758_v7 = vadd.f32 1.0, %v1464_v63  ;;  %v774_v8 = vmul.f32 0.5, %v740_v59  ;;  %v577_v31 = vadd.f32 %v1693_v48, %v305_v33  ;;  %v680_v40 = vmul.f32 0.5, %v572_v30  ;;  %v1738_v30 = vld [vmem:[%s1723_s12 + $0x30] sm:$0xff]  ;;  %v1741_v33 = vld [vmem:[%s1723_s12 + $0x38] sm:$0xff] }
 0x111   : > { %891 = vperm.xlu0 %1431, %v771_v41   ;;  %v1468_v11 = vpop.eup %1467  ;;  %v741_v16 = vadd.f32 1.0, %v1466_v6  ;;  %v791_v18 = vmul.f32 0.5, %v757_v2  ;;  %v582_v42 = vadd.f32 %v1690_v43, %v306_v37  ;;  %1489 = vtanh.f32 %v679_v38  ;;  %v1753_v37 = vld [vmem:[%s1723_s12 + $0x158] sm:$0xff]  ;;  %v1756_v38 = vld [vmem:[%s1723_s12 + $0x120] sm:$0xff] }
 0x112   : > { %896 = vperm.xlu1 %1432, %v772_v46   ;;  %v1470_v19 = vpop.eup %1469  ;;  %v742_v20 = vadd.f32 1.0, %v1468_v11  ;;  %v792_v21 = vmul.f32 0.5, %v758_v7  ;;  %v681_v50 = vmul.f32 0.5, %v577_v31  ;;  %v662_v51 = vadd.f32 %v1683_v28, %v322_v27  ;;  %v1759_v31 = vld [vmem:[%s1723_s12 + $0x128] sm:$0xff]  ;;  %v1774_v27 = vld [vmem:[%s1723_s12 + $0x50] sm:$0xff] }
 0x113   : > { %v1472_v23 = vpop.eup %1471  ;;  %v759_v26 = vadd.f32 1.0, %v1470_v19  ;;  %v775_v29 = vmul.f32 0.5, %v741_v16  ;;  %v657_v52 = vadd.f32 %v1687_v32, %v321_v44  ;;  %1491 = vtanh.f32 %v680_v40  ;;  %v1765_v40 = vld [vmem:[%s1723_s12 + $0x28] sm:$0xff]  ;;  %v1777_v44 = vld [vmem:[%s1723_s12 + $0x58] sm:$0xff] }
 0x114   : > { %v1474_v15 = vpop.eup %1473  ;;  %v760_v35 = vadd.f32 1.0, %v1472_v23  ;;  %v776_v36 = vmul.f32 0.5, %v742_v20  ;;  %v682_v53 = vmul.f32 0.5, %v582_v42  ;;  %1493 = vtanh.f32 %v681_v50  ;;  %v1771_v42 = vld [vmem:[%s1723_s12 + $0x148] sm:$0xff]  ;;  %v1792_v50 = vld [vmem:[%s1723_s12 + $0x160] sm:$0xff] }
 0x115   : > { %981 = vperm.xlu0 %1431, %v789_v54   ;;  %v1476_v34 = vpop.eup %1475  ;;  %v793_v41 = vmul.f32 0.5, %v759_v26  ;;  %v744_v46 = vadd.f32 1.0, %v1474_v15  ;;  %v697_v59 = vmul.f32 0.5, %v657_v52  ;;  %v698_v63 = vmul.f32 0.5, %v662_v51  ;;  %v1729_v15 = vld [vmem:[%s1723_s12 + $0x138] sm:$0xff]  ;;  %v1732_v26 = vld [vmem:[%s1723_s12 + $0x10] sm:$0xff] }
 0x116   : > { %986 = vperm.xlu1 %1432, %v790_v60   ;;  %v743_v39 = vadd.f32 1.0, %v1476_v34  ;;  %v1478_v45 = vpop.eup %1477  ;;  %v794_v47 = vmul.f32 0.5, %v760_v35  ;;  %1495 = vtanh.f32 %v682_v53  ;;  %v1744_v34 = vld [vmem:[%s1723_s12] sm:$0xff]  ;;  %v1747_v35 = vld [vmem:[%s1723_s12 + $0x8] sm:$0xff]  ;;  %v1798_v52 = vld [vmem:[%s1723_s12 + $0x70] sm:$0xff] }
 0x117   : > { %v1480_v49 = vpop.eup %1479  ;;  %v761_v48 = vadd.f32 1.0, %v1478_v45  ;;  %v778_v56 = vmul.f32 0.5, %v744_v46  ;;  %1497 = vtanh.f32 %v697_v59  ;;  %v1780_v45 = vld [vmem:[%s1723_s12 + $0x40] sm:$0xff]  ;;  %v1783_v46 = vld [vmem:[%s1723_s12 + $0x48] sm:$0xff]  ;;  %v1822_v59 = vld [vmem:[%s1723_s12 + $0x90] sm:$0xff] }
 0x118   : > { %v777_v54 = vmul.f32 0.5, %v743_v39  ;;  %v1482_v55 = vpop.eup %1481  ;;  %v762_v43 = vadd.f32 1.0, %v1480_v49  ;;  %1499 = vtanh.f32 %v698_v63  ;;  %v1762_v39 = vld [vmem:[%s1723_s12 + $0x20] sm:$0xff]  ;;  %v1789_v49 = vld [vmem:[%s1723_s12 + $0x178] sm:$0xff]  ;;  %v1795_v51 = vld [vmem:[%s1723_s12 + $0x168] sm:$0xff] }
 0x119   : > { %901 = vperm.xlu0 %1431, %v773_v4   ;;  %v1484_v58 = vpop.eup %1483  ;;  %v745_v62 = vadd.f32 1.0, %v1482_v55  ;;  %v795_v28 = vmul.f32 0.5, %v761_v48  ;;  %v1801_v48 = vld [vmem:[%s1723_s12 + $0x78] sm:$0xff]  ;;  %v1804_v53 = vld [vmem:[%s1723_s12 + $0x60] sm:$0xff]  ;;  %v1810_v55 = vld [vmem:[%s1723_s12 + $0x190] sm:$0xff] }
 0x11a   : > { %906 = vperm.xlu1 %1432, %v774_v8   ;;  %v1486_v60 = vpop.eup %1485  ;;  %v746_v32 = vadd.f32 1.0, %v1484_v58  ;;  %v796_v61 = vmul.f32 0.5, %v762_v43  ;;  %v1813_v43 = vld [vmem:[%s1723_s12 + $0x198] sm:$0xff]  ;;  %v1819_v58 = vld [vmem:[%s1723_s12 + $0x188] sm:$0xff] }
 0x11b   : > { %v1488_v0 = vpop.eup %1487  ;;  %v779_v2 = vmul.f32 0.5, %v745_v62  ;;  %v764_v4 = vadd.f32 1.0, %v1486_v60  ;;  %v1825_v60 = vld [vmem:[%s1723_s12 + $0x98] sm:$0xff]  ;;  %v1828_v62 = vld [vmem:[%s1723_s12 + $0x80] sm:$0xff]  ;;  %v1831_v63 = vld [vmem:[%s1723_s12 + $0x88] sm:$0xff] }
 0x11c   : > { %v763_v1 = vadd.f32 1.0, %v1488_v0  ;;  %v1490_v3 = vpop.eup %1489  ;;  %v780_v57 = vmul.f32 0.5, %v746_v32  ;;  %v1837_v0 = vld [vmem:[%s1723_s12 + $0x1b8] sm:$0xff]  ;;  %v1840_v32 = vld [vmem:[%s1723_s12 + $0x1a0] sm:$0xff] }
 0x11d   : > { %991 = vperm.xlu0 %1431, %v791_v18   ;;  %v1492_v5 = vpop.eup %1491  ;;  %v747_v6 = vadd.f32 1.0, %v1490_v3  ;;  %v798_v12 = vmul.f32 0.5, %v764_v4  ;;  %v1852_v3 = vld [vmem:[%s1723_s12 + $0xa0] sm:$0xff]  ;;  %v1855_v4 = vld [vmem:[%s1723_s12 + $0xa8] sm:$0xff] }
 0x11e   : > { %996 = vperm.xlu1 %1432, %v792_v21   ;;  %v797_v7 = vmul.f32 0.5, %v763_v1  ;;  %v1494_v8 = vpop.eup %1493  ;;  %v748_v11 = vadd.f32 1.0, %v1492_v5  ;;  %v1846_v1 = vld [vmem:[%s1723_s12 + $0xb0] sm:$0xff]  ;;  %v1861_v5 = vld [vmem:[%s1723_s12 + $0x1d8] sm:$0xff] }
 0x11f   : > { %v749_v14 = vadd.f32 1.0, %v1494_v8  ;;  %v781_v16 = vmul.f32 0.5, %v747_v6  ;;  %v1864_v6 = vld [vmem:[%s1723_s12 + $0x1c0] sm:$0xff]  ;;  %v1870_v8 = vld [vmem:[%s1723_s12 + $0xd0] sm:$0xff] }
 0x120   : > { %v1496_v13 = vpop.eup %1495  ;;  %v782_v9 = vmul.f32 0.5, %v748_v11  ;;  %v1873_v11 = vld [vmem:[%s1723_s12 + $0xd8] sm:$0xff] }
 0x121   : > { %911 = vperm.xlu0 %1431, %v775_v29   ;;  %v1498_v17 = vpop.eup %1497  ;;  %v750_v18 = vadd.f32 1.0, %v1496_v13  ;;  %v783_v21 = vmul.f32 0.5, %v749_v14  ;;  %v1735_v29 = vld [vmem:[%s1723_s12 + $0x18] sm:$0xff]  ;;  %v1879_v13 = vld [vmem:[%s1723_s12 + $0xc8] sm:$0xff]  ;;  %v1882_v14 = vld [vmem:[%s1723_s12 + $0x1f0] sm:$0xff] }
 0x122   : > { %916 = vperm.xlu1 %1432, %v776_v36   ;;  %v1500_v19 = vpop.eup %1499  ;;  %v765_v20 = vadd.f32 1.0, %v1498_v17  ;;  %v1750_v36 = vld [vmem:[%s1723_s12 + $0x150] sm:$0xff]  ;;  %v1888_v17 = vld [vmem:[%s1723_s12 + $0x1e0] sm:$0xff] }
 0x123   : > { %v766_v22 = vadd.f32 1.0, %v1500_v19  ;;  %v784_v23 = vmul.f32 0.5, %v750_v18  ;;  %v1891_v18 = vld [vmem:[%s1723_s12 + $0x1e8] sm:$0xff]  ;;  %v1897_v19 = vld [vmem:[%s1723_s12 + $0xf8] sm:$0xff] }
 0x124   : > { %v799_v24 = vmul.f32 0.5, %v765_v20  ;;  %2116 = vst [vmem:[#allocation4_spill] sm:$0xff] %v1897_v19  ;;  %v1900_v20 = vld [vmem:[%s1723_s12 + $0xe0] sm:$0xff] }
 0x125   : > { %1001 = vperm.xlu0 %1431, %v793_v41   ;;  %v800_v10 = vmul.f32 0.5, %v766_v22  ;;  %v1768_v41 = vld [vmem:[%s1723_s12 + $0x140] sm:$0xff]  ;;  %2117 = vst [vmem:[#allocation5_spill] sm:$0xff] %v1900_v20  ;;  %v1906_v22 = vld [vmem:[%s1723_s12 + $0x110] sm:$0xff] }
 0x126   : > { %1006 = vperm.xlu1 %1432, %v794_v47   ;;  %v1786_v47 = vld [vmem:[%s1723_s12 + $0x170] sm:$0xff]  ;;  %2119 = vst [vmem:[#allocation7_spill] sm:$0xff] %v1906_v22  ;;  %v1928_v22 = vld [vmem:[%s1723_s12 + $0x218] sm:$0xff] }
 0x127   : > { %2124 = vst [vmem:[#allocation12_spill] sm:$0xff] %v1928_v22 }
 0x129   : > { %921 = vperm.xlu0 %1431, %v777_v54   ;;  %v1807_v54 = vld [vmem:[%s1723_s12 + $0x68] sm:$0xff] }
 0x12a   : > { %926 = vperm.xlu1 %1432, %v778_v56   ;;  %v1816_v56 = vld [vmem:[%s1723_s12 + $0x180] sm:$0xff] }
 0x12d   : > { %1011 = vperm.xlu0 %1431, %v795_v28   ;;  %v1834_v28 = vld [vmem:[%s1723_s12 + $0x1b0] sm:$0xff] }
 0x12e   : > { %1016 = vperm.xlu1 %1432, %v796_v61   ;;  %v1843_v61 = vld [vmem:[%s1723_s12 + $0x1a8] sm:$0xff] }
 0x131   : > { %931 = vperm.xlu0 %1431, %v779_v2   ;;  %v1849_v2 = vld [vmem:[%s1723_s12 + $0xb8] sm:$0xff] }
 0x132   : > { %936 = vperm.xlu1 %1432, %v780_v57   ;;  %v1858_v57 = vld [vmem:[%s1723_s12 + $0x1d0] sm:$0xff] }
 0x135   : > { %1021 = vperm.xlu0 %1431, %v797_v7   ;;  %v1867_v7 = vld [vmem:[%s1723_s12 + $0x1c8] sm:$0xff] }
 0x136   : > { %1026 = vperm.xlu1 %1432, %v798_v12   ;;  %v1876_v12 = vld [vmem:[%s1723_s12 + $0xc0] sm:$0xff] }
 0x139   : > { %941 = vperm.xlu0 %1431, %v781_v16   ;;  %v1885_v16 = vld [vmem:[%s1723_s12 + $0x1f8] sm:$0xff] }
 0x13a   : > { %946 = vperm.xlu1 %1432, %v782_v9   ;;  %2114 = vst [vmem:[#allocation2_spill] sm:$0xff] %v1885_v16  ;;  %v1894_v9 = vld [vmem:[%s1723_s12 + $0xf0] sm:$0xff] }
 0x13b   : > { %2115 = vst [vmem:[#allocation3_spill] sm:$0xff] %v1894_v9  ;;  %v1918_v16 = vld [vmem:[%s1723_s12 + $0x210] sm:$0xff] }
 0x13c   : > { %2123 = vst [vmem:[#allocation11_spill] sm:$0xff] %v1918_v16 }
 0x13d   : > { %951 = vperm.xlu0 %1431, %v783_v21   ;;  %v1903_v21 = vld [vmem:[%s1723_s12 + $0xe8] sm:$0xff] }
 0x13e   : > { %956 = vperm.xlu1 %1432, %v784_v23   ;;  %2118 = vst [vmem:[#allocation6_spill] sm:$0xff] %v1903_v21  ;;  %v1909_v23 = vld [vmem:[%s1723_s12 + $0x118] sm:$0xff] }
 0x13f   : > { %2120 = vst [vmem:[#allocation8_spill] sm:$0xff] %v1909_v23  ;;  %v1931_v23 = vld [vmem:[%s1723_s12 + $0x200] sm:$0xff] }
 0x141   : > { %1031 = vperm.xlu0 %1431, %v799_v24   ;;  %v1912_v24 = vld [vmem:[%s1723_s12 + $0x100] sm:$0xff] }
 0x142   : > { %1036 = vperm.xlu1 %1432, %v800_v10   ;;  %2121 = vst [vmem:[#allocation9_spill] sm:$0xff] %v1912_v24  ;;  %v1915_v10 = vld [vmem:[%s1723_s12 + $0x108] sm:$0xff] }
 0x143   : > { %2122 = vst [vmem:[#allocation10_spill] sm:$0xff] %v1915_v10  ;;  %v1934_v24 = vld [vmem:[%s1723_s12 + $0x208] sm:$0xff] }
 0x144   : > { %2125 = vst [vmem:[#allocation13_spill] sm:$0xff] %v1934_v24 }
 0x180   : > { %v877_v19 = vpop.permute.xlu0 %876 }
 0x181   : > { %v967_v16 = vpop.permute.xlu1 %966  ;;  %v1041_v10 = vmul.f32 %v877_v19, %v1732_v26  ;;  %v1042_v9 = vmul.f32 %v877_v19, %v1735_v29 }
 0x182   : > { %v1077_v21 = vmul.f32 %v967_v16, %v1726_v25  ;;  %v1078_v20 = vmul.f32 %v967_v16, %v1729_v15 }
 0x183   : > { %1110 = vst [vmem:[%s1925_s16 + $0x10] sm:$0xff] %v1041_v10  ;;  %1111 = vst.msk [vmem:[%s1925_s16 + $0x18] sm:$0xff] %vm1108_vm2, %v1042_v9 }
 0x184   : > { %v872_v22 = vpop.permute.xlu0 %871  ;;  %1146 = vst [vmem:[%s1925_s16 + $0x130] sm:$0xff] %v1077_v21  ;;  %1147 = vst.msk [vmem:[%s1925_s16 + $0x138] sm:$0xff] %vm1108_vm2, %v1078_v20 }
 0x185   : > { %v887_v24 = vpop.permute.xlu1 %886  ;;  %v1039_v26 = vmul.f32 %v872_v22, %v1744_v34  ;;  %v1040_v29 = vmul.f32 %v872_v22, %v1747_v35 }
 0x186   : > { %v1045_v25 = vmul.f32 %v887_v24, %v1738_v30  ;;  %v1046_v15 = vmul.f32 %v887_v24, %v1741_v33 }
 0x187   : > { %1107 = vst [vmem:[%s1925_s16] sm:$0xff] %v1039_v26  ;;  %1109 = vst.msk [vmem:[%s1925_s16 + $0x8] sm:$0xff] %vm1108_vm2, %v1040_v29 }
 0x188   : > { %v962_v16 = vpop.permute.xlu0 %961  ;;  %1114 = vst [vmem:[%s1925_s16 + $0x30] sm:$0xff] %v1045_v25  ;;  %1115 = vst.msk [vmem:[%s1925_s16 + $0x38] sm:$0xff] %vm1108_vm2, %v1046_v15 }
 0x189   : > { %v977_v9 = vpop.permute.xlu1 %976  ;;  %v1075_v34 = vmul.f32 %v962_v16, %v1756_v38  ;;  %v1076_v35 = vmul.f32 %v962_v16, %v1759_v31 }
 0x18a   : > { %v1081_v30 = vmul.f32 %v977_v9, %v1750_v36  ;;  %v1082_v33 = vmul.f32 %v977_v9, %v1753_v37 }
 0x18b   : > { %1144 = vst [vmem:[%s1925_s16 + $0x120] sm:$0xff] %v1075_v34  ;;  %1145 = vst.msk [vmem:[%s1925_s16 + $0x128] sm:$0xff] %vm1108_vm2, %v1076_v35 }
 0x18c   : > { %v972_v19 = vpop.permute.xlu0 %971  ;;  %1150 = vst [vmem:[%s1925_s16 + $0x150] sm:$0xff] %v1081_v30  ;;  %1151 = vst.msk [vmem:[%s1925_s16 + $0x158] sm:$0xff] %vm1108_vm2, %v1082_v33 }
 0x18d   : > { %v882_v20 = vpop.permute.xlu1 %881  ;;  %v1079_v38 = vmul.f32 %v972_v19, %v1768_v41  ;;  %v1080_v31 = vmul.f32 %v972_v19, %v1771_v42 }
 0x18e   : > { %v1043_v36 = vmul.f32 %v882_v20, %v1762_v39  ;;  %v1044_v37 = vmul.f32 %v882_v20, %v1765_v40 }
 0x18f   : > { %1148 = vst [vmem:[%s1925_s16 + $0x140] sm:$0xff] %v1079_v38  ;;  %1149 = vst.msk [vmem:[%s1925_s16 + $0x148] sm:$0xff] %vm1108_vm2, %v1080_v31 }
 0x190   : > { %v892_v21 = vpop.permute.xlu0 %891  ;;  %1112 = vst [vmem:[%s1925_s16 + $0x20] sm:$0xff] %v1043_v36  ;;  %1113 = vst.msk [vmem:[%s1925_s16 + $0x28] sm:$0xff] %vm1108_vm2, %v1044_v37 }
 0x191   : > { %v897_v22 = vpop.permute.xlu1 %896  ;;  %v1047_v41 = vmul.f32 %v892_v21, %v1780_v45  ;;  %v1048_v42 = vmul.f32 %v892_v21, %v1783_v46  ;;  %v2126_v21 = vld [vmem:[#allocation2_spill] sm:$0xff] }
 0x192   : > { %v1049_v39 = vmul.f32 %v897_v22, %v1774_v27  ;;  %v1050_v40 = vmul.f32 %v897_v22, %v1777_v44 }
 0x193   : > { %1116 = vst [vmem:[%s1925_s16 + $0x40] sm:$0xff] %v1047_v41  ;;  %1117 = vst.msk [vmem:[%s1925_s16 + $0x48] sm:$0xff] %vm1108_vm2, %v1048_v42  ;;  %v2127_v42 = vld [vmem:[#allocation5_spill] sm:$0xff] }
 0x194   : > { %v982_v24 = vpop.permute.xlu0 %981  ;;  %1118 = vst [vmem:[%s1925_s16 + $0x50] sm:$0xff] %v1049_v39  ;;  %1119 = vst.msk [vmem:[%s1925_s16 + $0x58] sm:$0xff] %vm1108_vm2, %v1050_v40  ;;  %v2128_v39 = vld [vmem:[#allocation6_spill] sm:$0xff]  ;;  %v2129_v40 = vld [vmem:[#allocation3_spill] sm:$0xff] }
 0x195   : > { %v987_v10 = vpop.permute.xlu1 %986  ;;  %v1083_v45 = vmul.f32 %v982_v24, %v1792_v50  ;;  %v1084_v46 = vmul.f32 %v982_v24, %v1795_v51  ;;  %v2130_v24 = vld [vmem:[#allocation4_spill] sm:$0xff] }
 0x196   : > { %v1085_v27 = vmul.f32 %v987_v10, %v1786_v47  ;;  %v1086_v44 = vmul.f32 %v987_v10, %v1789_v49 }
 0x197   : > { %1152 = vst [vmem:[%s1925_s16 + $0x160] sm:$0xff] %v1083_v45  ;;  %1153 = vst.msk [vmem:[%s1925_s16 + $0x168] sm:$0xff] %vm1108_vm2, %v1084_v46 }
 0x198   : > { %v902_v26 = vpop.permute.xlu0 %901  ;;  %1154 = vst [vmem:[%s1925_s16 + $0x170] sm:$0xff] %v1085_v27  ;;  %1155 = vst.msk [vmem:[%s1925_s16 + $0x178] sm:$0xff] %vm1108_vm2, %v1086_v44  ;;  %v2131_v27 = vld [vmem:[#allocation9_spill] sm:$0xff] }
 0x199   : > { %v907_v29 = vpop.permute.xlu1 %906  ;;  %v1051_v50 = vmul.f32 %v902_v26, %v1804_v53  ;;  %v1052_v51 = vmul.f32 %v902_v26, %v1807_v54  ;;  %v2132_v26 = vld [vmem:[#allocation10_spill] sm:$0xff] }
 0x19a   : > { %v1053_v47 = vmul.f32 %v907_v29, %v1798_v52  ;;  %v1054_v49 = vmul.f32 %v907_v29, %v1801_v48 }
 0x19b   : > { %1120 = vst [vmem:[%s1925_s16 + $0x60] sm:$0xff] %v1051_v50  ;;  %1121 = vst.msk [vmem:[%s1925_s16 + $0x68] sm:$0xff] %vm1108_vm2, %v1052_v51  ;;  %v2133_v50 = vld [vmem:[#allocation7_spill] sm:$0xff] }
 0x19c   : > { %v992_v25 = vpop.permute.xlu0 %991  ;;  %1122 = vst [vmem:[%s1925_s16 + $0x70] sm:$0xff] %v1053_v47  ;;  %1123 = vst.msk [vmem:[%s1925_s16 + $0x78] sm:$0xff] %vm1108_vm2, %v1054_v49  ;;  %v2134_v47 = vld [vmem:[#allocation8_spill] sm:$0xff] }
 0x19d   : > { %v997_v15 = vpop.permute.xlu1 %996  ;;  %v1087_v53 = vmul.f32 %v992_v25, %v1816_v56  ;;  %v1088_v54 = vmul.f32 %v992_v25, %v1819_v58 }
 0x19e   : > { %v1089_v52 = vmul.f32 %v997_v15, %v1810_v55  ;;  %v1090_v48 = vmul.f32 %v997_v15, %v1813_v43 }
 0x19f   : > { %1156 = vst [vmem:[%s1925_s16 + $0x180] sm:$0xff] %v1087_v53  ;;  %1157 = vst.msk [vmem:[%s1925_s16 + $0x188] sm:$0xff] %vm1108_vm2, %v1088_v54  ;;  %v2135_v54 = vld [vmem:[#allocation13_spill] sm:$0xff] }
 0x1a0   : > { %v912_v16 = vpop.permute.xlu0 %911  ;;  %1158 = vst [vmem:[%s1925_s16 + $0x190] sm:$0xff] %v1089_v52  ;;  %1159 = vst.msk [vmem:[%s1925_s16 + $0x198] sm:$0xff] %vm1108_vm2, %v1090_v48  ;;  %v2136_v48 = vld [vmem:[#allocation11_spill] sm:$0xff] }
 0x1a1   : > { %v917_v9 = vpop.permute.xlu1 %916  ;;  %v1055_v56 = vmul.f32 %v912_v16, %v1828_v62  ;;  %v1056_v58 = vmul.f32 %v912_v16, %v1831_v63 }
 0x1a2   : > { %v1057_v55 = vmul.f32 %v917_v9, %v1822_v59  ;;  %v1058_v43 = vmul.f32 %v917_v9, %v1825_v60  ;;  %v2137_v9 = vld [vmem:[#allocation12_spill] sm:$0xff] }
 0x1a3   : > { %1124 = vst [vmem:[%s1925_s16 + $0x80] sm:$0xff] %v1055_v56  ;;  %1125 = vst.msk [vmem:[%s1925_s16 + $0x88] sm:$0xff] %vm1108_vm2, %v1056_v58 }
 0x1a4   : > { %v1002_v34 = vpop.permute.xlu0 %1001  ;;  %1126 = vst [vmem:[%s1925_s16 + $0x90] sm:$0xff] %v1057_v55  ;;  %1127 = vst.msk [vmem:[%s1925_s16 + $0x98] sm:$0xff] %vm1108_vm2, %v1058_v43 }
 0x1a5   : > { %v1007_v35 = vpop.permute.xlu1 %1006  ;;  %v1091_v62 = vmul.f32 %v1002_v34, %v1840_v32  ;;  %v1092_v63 = vmul.f32 %v1002_v34, %v1843_v61 }
 0x1a6   : > { %v1093_v59 = vmul.f32 %v1007_v35, %v1834_v28  ;;  %v1094_v60 = vmul.f32 %v1007_v35, %v1837_v0 }
 0x1a7   : > { %1160 = vst [vmem:[%s1925_s16 + $0x1a0] sm:$0xff] %v1091_v62  ;;  %1161 = vst.msk [vmem:[%s1925_s16 + $0x1a8] sm:$0xff] %vm1108_vm2, %v1092_v63 }
 0x1a8   : > { %v922_v30 = vpop.permute.xlu0 %921  ;;  %1162 = vst [vmem:[%s1925_s16 + $0x1b0] sm:$0xff] %v1093_v59  ;;  %1163 = vst.msk [vmem:[%s1925_s16 + $0x1b8] sm:$0xff] %vm1108_vm2, %v1094_v60 }
 0x1a9   : > { %v927_v33 = vpop.permute.xlu1 %926  ;;  %v1059_v32 = vmul.f32 %v922_v30, %v1852_v3  ;;  %v1060_v61 = vmul.f32 %v922_v30, %v1855_v4 }
 0x1aa   : > { %v1061_v28 = vmul.f32 %v927_v33, %v1846_v1  ;;  %v1062_v0 = vmul.f32 %v927_v33, %v1849_v2 }
 0x1ab   : > { %1128 = vst [vmem:[%s1925_s16 + $0xa0] sm:$0xff] %v1059_v32  ;;  %1129 = vst.msk [vmem:[%s1925_s16 + $0xa8] sm:$0xff] %vm1108_vm2, %v1060_v61 }
 0x1ac   : > { %v1012_v19 = vpop.permute.xlu0 %1011  ;;  %1130 = vst [vmem:[%s1925_s16 + $0xb0] sm:$0xff] %v1061_v28  ;;  %1131 = vst.msk [vmem:[%s1925_s16 + $0xb8] sm:$0xff] %vm1108_vm2, %v1062_v0 }
 0x1ad   : > { %v1017_v20 = vpop.permute.xlu1 %1016  ;;  %v1095_v3 = vmul.f32 %v1012_v19, %v1864_v6  ;;  %v1096_v4 = vmul.f32 %v1012_v19, %v1867_v7 }
 0x1ae   : > { %v1097_v1 = vmul.f32 %v1017_v20, %v1858_v57  ;;  %v1098_v2 = vmul.f32 %v1017_v20, %v1861_v5 }
 0x1af   : > { %1164 = vst [vmem:[%s1925_s16 + $0x1c0] sm:$0xff] %v1095_v3  ;;  %1165 = vst.msk [vmem:[%s1925_s16 + $0x1c8] sm:$0xff] %vm1108_vm2, %v1096_v4 }
 0x1b0   : > { %v932_v38 = vpop.permute.xlu0 %931  ;;  %1166 = vst [vmem:[%s1925_s16 + $0x1d0] sm:$0xff] %v1097_v1  ;;  %1167 = vst.msk [vmem:[%s1925_s16 + $0x1d8] sm:$0xff] %vm1108_vm2, %v1098_v2 }
 0x1b1   : > { %v937_v31 = vpop.permute.xlu1 %936  ;;  %v1063_v6 = vmul.f32 %v932_v38, %v1876_v12  ;;  %v1064_v7 = vmul.f32 %v932_v38, %v1879_v13 }
 0x1b2   : > { %v1065_v57 = vmul.f32 %v937_v31, %v1870_v8  ;;  %v1066_v5 = vmul.f32 %v937_v31, %v1873_v11 }
 0x1b3   : > { %1132 = vst [vmem:[%s1925_s16 + $0xc0] sm:$0xff] %v1063_v6  ;;  %1133 = vst.msk [vmem:[%s1925_s16 + $0xc8] sm:$0xff] %vm1108_vm2, %v1064_v7 }
 0x1b4   : > { %v1022_v36 = vpop.permute.xlu0 %1021  ;;  %1134 = vst [vmem:[%s1925_s16 + $0xd0] sm:$0xff] %v1065_v57  ;;  %1135 = vst.msk [vmem:[%s1925_s16 + $0xd8] sm:$0xff] %vm1108_vm2, %v1066_v5 }
 0x1b5   : > { %v1027_v37 = vpop.permute.xlu1 %1026  ;;  %v1099_v12 = vmul.f32 %v1022_v36, %v1888_v17  ;;  %v1100_v13 = vmul.f32 %v1022_v36, %v1891_v18 }
 0x1b6   : > { %v1101_v8 = vmul.f32 %v1027_v37, %v1882_v14  ;;  %v1102_v11 = vmul.f32 %v1027_v37, %v2126_v21 }
 0x1b7   : > { %1168 = vst [vmem:[%s1925_s16 + $0x1e0] sm:$0xff] %v1099_v12  ;;  %1169 = vst.msk [vmem:[%s1925_s16 + $0x1e8] sm:$0xff] %vm1108_vm2, %v1100_v13 }
 0x1b8   : > { %v942_v22 = vpop.permute.xlu0 %941  ;;  %1170 = vst [vmem:[%s1925_s16 + $0x1f0] sm:$0xff] %v1101_v8  ;;  %1171 = vst.msk [vmem:[%s1925_s16 + $0x1f8] sm:$0xff] %vm1108_vm2, %v1102_v11 }
 0x1b9   : > { %v947_v41 = vpop.permute.xlu1 %946  ;;  %v1067_v17 = vmul.f32 %v942_v22, %v2127_v42  ;;  %v1068_v18 = vmul.f32 %v942_v22, %v2128_v39 }
 0x1ba   : > { %v1069_v14 = vmul.f32 %v947_v41, %v2129_v40  ;;  %v1070_v10 = vmul.f32 %v947_v41, %v2130_v24 }
 0x1bb   : > { %1136 = vst [vmem:[%s1925_s16 + $0xe0] sm:$0xff] %v1067_v17  ;;  %1137 = vst.msk [vmem:[%s1925_s16 + $0xe8] sm:$0xff] %vm1108_vm2, %v1068_v18 }
 0x1bc   : > { %v952_v45 = vpop.permute.xlu0 %951  ;;  %1138 = vst [vmem:[%s1925_s16 + $0xf0] sm:$0xff] %v1069_v14  ;;  %1139 = vst.msk [vmem:[%s1925_s16 + $0xf8] sm:$0xff] %vm1108_vm2, %v1070_v10 }
 0x1bd   : > { %v957_v46 = vpop.permute.xlu1 %956  ;;  %v1071_v44 = vmul.f32 %v952_v45, %v2131_v27  ;;  %v1072_v29 = vmul.f32 %v952_v45, %v2132_v26 }
 0x1be   : > { %v1073_v51 = vmul.f32 %v957_v46, %v2133_v50  ;;  %v1074_v49 = vmul.f32 %v957_v46, %v2134_v47 }
 0x1bf   : > { %1140 = vst [vmem:[%s1925_s16 + $0x100] sm:$0xff] %v1071_v44  ;;  %1141 = vst.msk [vmem:[%s1925_s16 + $0x108] sm:$0xff] %vm1108_vm2, %v1072_v29 }
 0x1c0   : > { %1142 = vst [vmem:[%s1925_s16 + $0x110] sm:$0xff] %v1073_v51  ;;  %1143 = vst.msk [vmem:[%s1925_s16 + $0x118] sm:$0xff] %vm1108_vm2, %v1074_v49  ;;  %v1032_v25 = vpop.permute.xlu0 %1031 }
 0x1c1   : > { %v1037_v15 = vpop.permute.xlu1 %1036  ;;  %v1103_v53 = vmul.f32 %v1032_v25, %v1931_v23  ;;  %v1104_v52 = vmul.f32 %v1032_v25, %v2135_v54 }
 0x1c2   : > { %v1105_v16 = vmul.f32 %v1037_v15, %v2136_v48  ;;  %v1106_v56 = vmul.f32 %v1037_v15, %v2137_v9 }
 0x1c3   : > { %1172 = vst [vmem:[%s1925_s16 + $0x200] sm:$0xff] %v1103_v53  ;;  %1173 = vst.msk [vmem:[%s1925_s16 + $0x208] sm:$0xff] %vm1108_vm2, %v1104_v52 }
 0x1c4   : > { %1174 = vst [vmem:[%s1925_s16 + $0x210] sm:$0xff] %v1105_v16  ;;  %1175 = vst.msk [vmem:[%s1925_s16 + $0x218] sm:$0xff] %vm1108_vm2, %v1106_v56 }
 0x1c5 PF: > { %s14_s15 = sadd.s32 1, %s1507_s15  }
 0x1c6   : > { %p11_p4 = scmp.ge.s32.totalorder %s14_s15, 5  }
 0x1c8   :  { %13 = sbr.rel (!%p11_p4) target bundleno = 1 (0x1), region = 72 }

</bundles_post_ra>
